<compile_context>
chip_gen: v5e
topology: v5e:2x2
jax: 0.10.0
libtpu: 0.0.40
codegen_flags: <defaults>
</compile_context>

<pallas_src>
import functools

import jax
import jax.numpy as jnp
from jax import lax
from jax.experimental import pallas as pl
from jax.experimental.pallas import tpu as pltpu

_F32_SUBLANE = 8
_VMEM_LIMIT_BYTES = 32 * 1024 * 1024  # raise v5e's 16 MiB default scoped VMEM


# ----------------------------------------------------------------------------
# In-kernel helpers
# ----------------------------------------------------------------------------

def _dilated_taps_matmul(xp, w2d, out_len, kernel_size, dilation):
    """Dilated causal conv core:  sum_k W_k @ xp[:, k*d : k*d + out_len].

    xp  : (C, >= (K-1)*d + out_len) causally left-padded value (f32)
    w2d : (C_out, K*C) packed so that w2d[co, k*C + ci] == w_torch[co, ci, k]
    Returns (C_out, out_len) f32 (MXU accumulate in f32).
    """
    C = xp.shape[0]
    if kernel_size > 1 and C % _F32_SUBLANE == 0:
        # im2col: one wide MXU matmul (contraction depth K*C).  The sublane-axis
        # concat is tile-aligned because C is a multiple of 8 (f32 sublane).
        xcol = jnp.concatenate(
            [xp[:, k * dilation:k * dilation + out_len]
             for k in range(kernel_size)],
            axis=0)
        return jnp.dot(w2d, xcol, preferred_element_type=jnp.float32)
    # Tiny / sublane-unaligned channel counts: K small dots, f32 accumulate.
    acc = jnp.dot(w2d[:, :C], xp[:, :out_len],
                  preferred_element_type=jnp.float32)
    for k in range(1, kernel_size):
        acc = acc + jnp.dot(
            w2d[:, k * C:(k + 1) * C],
            xp[:, k * dilation:k * dilation + out_len],
            preferred_element_type=jnp.float32)
    return acc


# ----------------------------------------------------------------------------
# Fused TemporalBlock kernel
# ----------------------------------------------------------------------------

def _temporal_block_kernel(x_ref, w1_ref, b1_ref, w2_ref, b2_ref, *rest,
                           dilation, seq_len, kernel_size, has_downsample):
    """conv1+chomp+relu1 -> conv2+chomp+relu2 -> (+res) -> relu, fully fused.

    x_ref : (1, C_in, L)           one batch element
    w1_ref: (C_out, K*C_in)        packed conv1 weight
    b1_ref: (C_out, 1)
    w2_ref: (C_out, K*C_out)       packed conv2 weight
    b2_ref: (C_out, 1)
    [wd_ref: (C_out, C_in), bd_ref: (C_out, 1)]   only if has_downsample
    o_ref : (1, C_out, L)
    xp_ref: (C_in, 2*pad + L)      VMEM scratch (causally padded input)
    """
    if has_downsample:
        wd_ref, bd_ref, o_ref, xp_ref = rest
    else:
        o_ref, xp_ref = rest

    L = seq_len
    K = kernel_size
    pad = (K - 1) * dilation            # causal pad of one conv
    pad2 = 2 * pad                      # enough left context for conv1 ∘ conv2

    # ---- build the causally left-padded input inside VMEM (no HBM pad copy)
    if pad2 > 0:
        xp_ref[...] = jnp.zeros_like(xp_ref)
    xp_ref[:, pad2:] = x_ref[0].astype(jnp.float32)
    xp = xp_ref[...]                                    # (C_in, pad2 + L)

    w1 = w1_ref[...].astype(jnp.float32)
    w2 = w2_ref[...].astype(jnp.float32)

    # ---- conv1 (+bias, relu1), evaluated over [-pad, L) so conv2's own left
    #      padding of h is available without another HBM round trip.
    h = _dilated_taps_matmul(xp, w1, pad + L, K, dilation) + b1_ref[...]
    h = jnp.maximum(h, 0.0)                             # relu1 (dropout1 = id)
    if pad > 0:
        # positions before t=0 must be zeros (conv2 zero-pads h, then chomps)
        col = lax.broadcasted_iota(jnp.int32, h.shape, 1)
        h = jnp.where(col >= pad, h, 0.0)

    # ---- conv2 (+bias, relu2)
    out = _dilated_taps_matmul(h, w2, L, K, dilation) + b2_ref[...]
    out = jnp.maximum(out, 0.0)                         # relu2 (dropout2 = id)

    # ---- residual (identity add, or fused 1x1 downsample) + final relu
    x_res = xp[:, pad2:]                                # original (C_in, L)
    if has_downsample:
        res = jnp.dot(wd_ref[...].astype(jnp.float32), x_res,
                      preferred_element_type=jnp.float32) + bd_ref[...]
    else:
        res = x_res                                     # plain VPU add
    o_ref[0] = jnp.maximum(out + res, 0.0).astype(o_ref.dtype)


# ----------------------------------------------------------------------------
# pallas_call wrapper for one TemporalBlock
# ----------------------------------------------------------------------------

def temporal_block_forward(x, p):
    """One fused TemporalBlock.  x: [B, C_in, L] -> [B, C_out, L]."""
    B, C_in, L = x.shape
    C_out = p["w1"].shape[0]
    K = p["kernel_size"]
    d = p["dilation"]
    pad = (K - 1) * d
    has_down = p["wd"] is not None

    kernel = functools.partial(
        _temporal_block_kernel, dilation=d, seq_len=L, kernel_size=K,
        has_downsample=has_down)

    in_specs = [
        pl.BlockSpec((1, C_in, L), lambda i: (i, 0, 0)),
        pl.BlockSpec((C_out, K * C_in), lambda i: (0, 0)),
        pl.BlockSpec((C_out, 1), lambda i: (0, 0)),
        pl.BlockSpec((C_out, K * C_out), lambda i: (0, 0)),
        pl.BlockSpec((C_out, 1), lambda i: (0, 0)),
    ]
    args = [x, p["w1"], p["b1"], p["w2"], p["b2"]]
    if has_down:
        in_specs += [pl.BlockSpec((C_out, C_in), lambda i: (0, 0)),
                     pl.BlockSpec((C_out, 1), lambda i: (0, 0))]
        args += [p["wd"], p["bd"]]

    return pl.pallas_call(
        kernel,
        out_shape=jax.ShapeDtypeStruct((B, C_out, L), x.dtype),
        grid=(B,),
        in_specs=in_specs,
        out_specs=pl.BlockSpec((1, C_out, L), lambda i: (i, 0, 0)),
        scratch_shapes=[pltpu.VMEM((C_in, 2 * pad + L), jnp.float32)],
        compiler_params=pltpu.CompilerParams(
            dimension_semantics=("parallel",),
            vmem_limit_bytes=_VMEM_LIMIT_BYTES),
    )(*args)


# ----------------------------------------------------------------------------
# Model: parameter init + forward
# ----------------------------------------------------------------------------

def init_temporal_conv_net(key, num_inputs, num_channels, kernel_size=2):
    """Mirrors TemporalBlock.init_weights: conv / downsample weights ~ N(0,.01),
    biases use PyTorch Conv1d default U(-1/sqrt(fan_in), 1/sqrt(fan_in)).
    Weights are pre-packed into the kernel's 2-D layout:
        w2d[co, k*C_in + ci] == w_torch[co, ci, k]."""
    params = []
    for i, out_ch in enumerate(num_channels):
        in_ch = num_inputs if i == 0 else num_channels[i - 1]
        key, k1, k2, k3, k4, k5, k6 = jax.random.split(key, 7)

        w1 = 0.01 * jax.random.normal(k1, (out_ch, in_ch, kernel_size),
                                      jnp.float32)
        bnd1 = 1.0 / (in_ch * kernel_size) ** 0.5
        b1 = jax.random.uniform(k2, (out_ch,), jnp.float32, -bnd1, bnd1)

        w2 = 0.01 * jax.random.normal(k3, (out_ch, out_ch, kernel_size),
                                      jnp.float32)
        bnd2 = 1.0 / (out_ch * kernel_size) ** 0.5
        b2 = jax.random.uniform(k4, (out_ch,), jnp.float32, -bnd2, bnd2)

        if in_ch != out_ch:
            wd = 0.01 * jax.random.normal(k5, (out_ch, in_ch), jnp.float32)
            bndd = 1.0 / in_ch ** 0.5
            bd = jax.random.uniform(k6, (out_ch,), jnp.float32,
                                    -bndd, bndd).reshape(out_ch, 1)
        else:
            wd = None   # identity residual: plain add in-kernel (no eye matmul)
            bd = None

        params.append(dict(
            w1=jnp.transpose(w1, (0, 2, 1)).reshape(out_ch,
                                                    kernel_size * in_ch),
            b1=b1.reshape(out_ch, 1),
            w2=jnp.transpose(w2, (0, 2, 1)).reshape(out_ch,
                                                    kernel_size * out_ch),
            b2=b2.reshape(out_ch, 1),
            wd=wd, bd=bd,
            dilation=2 ** i, kernel_size=kernel_size))
    return params


def temporal_conv_net_forward(params, x):
    """x: [B, num_inputs, L] -> [B, num_channels[-1], L]"""
    for p in params:
        x = temporal_block_forward(x, p)
    return x


# ----------------------------------------------------------------------------
# Demo
# ----------------------------------------------------------------------------

if __name__ == "__main__":
    key = jax.random.PRNGKey(0)
    kparam, kx = jax.random.split(key)

    B, num_inputs, L = 2, 4, 16
    num_channels = [8, 8, 4]
    kernel_size = 2

    params = init_temporal_conv_net(kparam, num_inputs, num_channels,
                                    kernel_size)
    x = jax.random.normal(kx, (B, num_inputs, L), jnp.float32)

    out = temporal_conv_net_forward(params, x)
    out = jax.block_until_ready(out)

    assert out.shape == (B, num_channels[-1], L)
    assert bool(jnp.all(jnp.isfinite(out)))
    print("KERNEL_OK")
</pallas_src>

<mosaic_0001>
module attributes {stable_mosaic.version = 11 : i64} {
  func.func @_temporal_block_kernel(%arg0: i32, %arg1: memref<1x4x16xf32, #tpu.memory_space<vmem>>, %arg2: memref<8x8xf32, #tpu.memory_space<vmem>>, %arg3: memref<8x1xf32, #tpu.memory_space<vmem>>, %arg4: memref<8x16xf32, #tpu.memory_space<vmem>>, %arg5: memref<8x1xf32, #tpu.memory_space<vmem>>, %arg6: memref<8x4xf32, #tpu.memory_space<vmem>>, %arg7: memref<8x1xf32, #tpu.memory_space<vmem>>, %arg8: memref<1x8x16xf32, #tpu.memory_space<vmem>>, %arg9: memref<4x18xf32, #tpu.memory_space<vmem>>) attributes {dimension_semantics = [#tpu.dimension_semantics<parallel>], iteration_bounds = array<i64: 2>, scalar_prefetch = 0 : i64, scratch_operands = 1 : i64, tpu.core_type = #tpu.core_type<tc>, window_params = [{transform_indices = @transform_0, window_bounds = array<i64: 1, 4, 16>}, {pipeline_mode = #tpu.pipeline_mode<synchronous>, transform_indices = @transform_1, window_bounds = array<i64: 8, 8>}, {pipeline_mode = #tpu.pipeline_mode<synchronous>, transform_indices = @transform_2, window_bounds = array<i64: 8, 1>}, {pipeline_mode = #tpu.pipeline_mode<synchronous>, transform_indices = @transform_3, window_bounds = array<i64: 8, 16>}, {pipeline_mode = #tpu.pipeline_mode<synchronous>, transform_indices = @transform_4, window_bounds = array<i64: 8, 1>}, {pipeline_mode = #tpu.pipeline_mode<synchronous>, transform_indices = @transform_5, window_bounds = array<i64: 8, 4>}, {pipeline_mode = #tpu.pipeline_mode<synchronous>, transform_indices = @transform_6, window_bounds = array<i64: 8, 1>}, {transform_indices = @transform_7, window_bounds = array<i64: 1, 8, 16>}]} {
    %cst = arith.constant 0.000000e+00 : f32
    %0 = vector.broadcast %cst : f32 to vector<4x18xf32>
    %c0 = arith.constant 0 : index
    %c0_0 = arith.constant 0 : index
    %1 = vector.load %arg9[%c0, %c0_0] : memref<4x18xf32, #tpu.memory_space<vmem>>, vector<4x18xf32>
    tpu.vector_store %arg9[%c0, %c0_0], %0 {strides = array<i32>} : memref<4x18xf32, #tpu.memory_space<vmem>>, vector<4x18xf32>,
    %c0_1 = arith.constant 0 : index
    %c0_2 = arith.constant 0 : index
    %c0_3 = arith.constant 0 : index
    %2 = vector.load %arg1[%c0_1, %c0_2, %c0_3] : memref<1x4x16xf32, #tpu.memory_space<vmem>>, vector<1x4x16xf32>
    %3 = vector.shape_cast %2 : vector<1x4x16xf32> to vector<4x16xf32>
    %c0_4 = arith.constant 0 : index
    %c2 = arith.constant 2 : index
    %4 = vector.load %arg9[%c0_4, %c2] : memref<4x18xf32, #tpu.memory_space<vmem>>, vector<4x16xf32>
    tpu.vector_store %arg9[%c0_4, %c2], %3 {strides = array<i32>} : memref<4x18xf32, #tpu.memory_space<vmem>>, vector<4x16xf32>,
    %c0_5 = arith.constant 0 : index
    %c0_6 = arith.constant 0 : index
    %5 = vector.load %arg9[%c0_5, %c0_6] : memref<4x18xf32, #tpu.memory_space<vmem>>, vector<4x18xf32>
    %c0_7 = arith.constant 0 : index
    %c0_8 = arith.constant 0 : index
    %6 = vector.load %arg2[%c0_7, %c0_8] : memref<8x8xf32, #tpu.memory_space<vmem>>, vector<8x8xf32>
    %c0_9 = arith.constant 0 : index
    %c0_10 = arith.constant 0 : index
    %7 = vector.load %arg4[%c0_9, %c0_10] : memref<8x16xf32, #tpu.memory_space<vmem>>, vector<8x16xf32>
    %8 = vector.extract_strided_slice %6 {offsets = [0, 0], sizes = [8, 4], strides = [1, 1]} : vector<8x8xf32> to vector<8x4xf32>
    %9 = vector.extract_strided_slice %5 {offsets = [0, 0], sizes = [4, 17], strides = [1, 1]} : vector<4x18xf32> to vector<4x17xf32>
    %cst_11 = arith.constant dense<0.000000e+00> : vector<8x17xf32>
    %10 = tpu.matmul %8, %9, %cst_11 {dimension_numbers = #tpu.dot_dimension_numbers<[1], [0], [0], [1], [0, 0, 1, 1], [], []>} : vector<8x4xf32>, vector<4x17xf32>, vector<8x17xf32> -> vector<8x17xf32>
    %11 = vector.extract_strided_slice %6 {offsets = [0, 4], sizes = [8, 4], strides = [1, 1]} : vector<8x8xf32> to vector<8x4xf32>
    %12 = vector.extract_strided_slice %5 {offsets = [0, 1], sizes = [4, 17], strides = [1, 1]} : vector<4x18xf32> to vector<4x17xf32>
    %cst_12 = arith.constant dense<0.000000e+00> : vector<8x17xf32>
    %13 = tpu.matmul %11, %12, %cst_12 {dimension_numbers = #tpu.dot_dimension_numbers<[1], [0], [0], [1], [0, 0, 1, 1], [], []>} : vector<8x4xf32>, vector<4x17xf32>, vector<8x17xf32> -> vector<8x17xf32>
    %14 = arith.addf %10, %13 : vector<8x17xf32>
    %c0_13 = arith.constant 0 : index
    %c0_14 = arith.constant 0 : index
    %15 = vector.load %arg3[%c0_13, %c0_14] : memref<8x1xf32, #tpu.memory_space<vmem>>, vector<8x1xf32>
    %16 = vector.broadcast %15 : vector<8x1xf32> to vector<8x17xf32>
    %17 = arith.addf %14, %16 : vector<8x17xf32>
    %cst_15 = arith.constant 0.000000e+00 : f32
    %18 = vector.broadcast %cst_15 : f32 to vector<8x17xf32>
    %19 = arith.maximumf %17, %18 : vector<8x17xf32>
    %20 = tpu.iota {dimensions = array<i32: 1>} : vector<8x17xi32>
    %c1_i32 = arith.constant 1 : i32
    %21 = vector.broadcast %c1_i32 : i32 to vector<8x17xi32>
    %22 = arith.cmpi sge, %20, %21 : vector<8x17xi32>
    %cst_16 = arith.constant 0.000000e+00 : f32
    %23 = vector.broadcast %cst_16 : f32 to vector<8x17xf32>
    %24 = arith.select %22, %19, %23 : vector<8x17xi1>, vector<8x17xf32>
    %25 = vector.extract_strided_slice %24 {offsets = [0, 0], sizes = [8, 16], strides = [1, 1]} : vector<8x17xf32> to vector<8x16xf32>
    %26 = vector.extract_strided_slice %24 {offsets = [0, 1], sizes = [8, 16], strides = [1, 1]} : vector<8x17xf32> to vector<8x16xf32>
    %27 = tpu.concatenate %25, %26 in 0 : vector<8x16xf32>, vector<8x16xf32> -> vector<16x16xf32>
    %cst_17 = arith.constant dense<0.000000e+00> : vector<8x16xf32>
    %28 = tpu.matmul %7, %27, %cst_17 {dimension_numbers = #tpu.dot_dimension_numbers<[1], [0], [0], [1], [0, 0, 1, 1], [], []>} : vector<8x16xf32>, vector<16x16xf32>, vector<8x16xf32> -> vector<8x16xf32>
    %c0_18 = arith.constant 0 : index
    %c0_19 = arith.constant 0 : index
    %29 = vector.load %arg5[%c0_18, %c0_19] : memref<8x1xf32, #tpu.memory_space<vmem>>, vector<8x1xf32>
    %30 = vector.broadcast %29 : vector<8x1xf32> to vector<8x16xf32>
    %31 = arith.addf %28, %30 : vector<8x16xf32>
    %cst_20 = arith.constant 0.000000e+00 : f32
    %32 = vector.broadcast %cst_20 : f32 to vector<8x16xf32>
    %33 = arith.maximumf %31, %32 : vector<8x16xf32>
    %34 = vector.extract_strided_slice %5 {offsets = [0, 2], sizes = [4, 16], strides = [1, 1]} : vector<4x18xf32> to vector<4x16xf32>
    %c0_21 = arith.constant 0 : index
    %c0_22 = arith.constant 0 : index
    %35 = vector.load %arg6[%c0_21, %c0_22] : memref<8x4xf32, #tpu.memory_space<vmem>>, vector<8x4xf32>
    %cst_23 = arith.constant dense<0.000000e+00> : vector<8x16xf32>
    %36 = tpu.matmul %35, %34, %cst_23 {dimension_numbers = #tpu.dot_dimension_numbers<[1], [0], [0], [1], [0, 0, 1, 1], [], []>} : vector<8x4xf32>, vector<4x16xf32>, vector<8x16xf32> -> vector<8x16xf32>
    %c0_24 = arith.constant 0 : index
    %c0_25 = arith.constant 0 : index
    %37 = vector.load %arg7[%c0_24, %c0_25] : memref<8x1xf32, #tpu.memory_space<vmem>>, vector<8x1xf32>
    %38 = vector.broadcast %37 : vector<8x1xf32> to vector<8x16xf32>
    %39 = arith.addf %36, %38 : vector<8x16xf32>
    %40 = arith.addf %33, %39 : vector<8x16xf32>
    %cst_26 = arith.constant 0.000000e+00 : f32
    %41 = vector.broadcast %cst_26 : f32 to vector<8x16xf32>
    %42 = arith.maximumf %40, %41 : vector<8x16xf32>
    %c0_27 = arith.constant 0 : index
    %c0_28 = arith.constant 0 : index
    %c0_29 = arith.constant 0 : index
    %43 = vector.load %arg8[%c0_27, %c0_28, %c0_29] : memref<1x8x16xf32, #tpu.memory_space<vmem>>, vector<1x8x16xf32>
    %44 = vector.shape_cast %43 : vector<1x8x16xf32> to vector<8x16xf32>
    %45 = vector.shape_cast %42 : vector<8x16xf32> to vector<1x8x16xf32>
    tpu.vector_store %arg8[%c0_27, %c0_28, %c0_29], %45 {strides = array<i32>} : memref<1x8x16xf32, #tpu.memory_space<vmem>>, vector<1x8x16xf32>,
    return
  }
  func.func @transform_0(%arg0: i32) -> (i32, i32, i32) {
    %c0_i32 = arith.constant 0 : i32
    %c0_i32_0 = arith.constant 0 : i32
    %c0_i32_1 = arith.constant 0 : i32
    return %arg0, %c0_i32, %c0_i32_0 : i32, i32, i32
  }
  func.func @transform_1(%arg0: i32) -> (i32, i32) {
    %c0_i32 = arith.constant 0 : i32
    %c0_i32_0 = arith.constant 0 : i32
    %c0_i32_1 = arith.constant 0 : i32
    return %c0_i32, %c0_i32_0 : i32, i32
  }
  func.func @transform_2(%arg0: i32) -> (i32, i32) {
    %c0_i32 = arith.constant 0 : i32
    %c0_i32_0 = arith.constant 0 : i32
    %c0_i32_1 = arith.constant 0 : i32
    return %c0_i32, %c0_i32_0 : i32, i32
  }
  func.func @transform_3(%arg0: i32) -> (i32, i32) {
    %c0_i32 = arith.constant 0 : i32
    %c0_i32_0 = arith.constant 0 : i32
    %c0_i32_1 = arith.constant 0 : i32
    return %c0_i32, %c0_i32_0 : i32, i32
  }
  func.func @transform_4(%arg0: i32) -> (i32, i32) {
    %c0_i32 = arith.constant 0 : i32
    %c0_i32_0 = arith.constant 0 : i32
    %c0_i32_1 = arith.constant 0 : i32
    return %c0_i32, %c0_i32_0 : i32, i32
  }
  func.func @transform_5(%arg0: i32) -> (i32, i32) {
    %c0_i32 = arith.constant 0 : i32
    %c0_i32_0 = arith.constant 0 : i32
    %c0_i32_1 = arith.constant 0 : i32
    return %c0_i32, %c0_i32_0 : i32, i32
  }
  func.func @transform_6(%arg0: i32) -> (i32, i32) {
    %c0_i32 = arith.constant 0 : i32
    %c0_i32_0 = arith.constant 0 : i32
    %c0_i32_1 = arith.constant 0 : i32
    return %c0_i32, %c0_i32_0 : i32, i32
  }
  func.func @transform_7(%arg0: i32) -> (i32, i32, i32) {
    %c0_i32 = arith.constant 0 : i32
    %c0_i32_0 = arith.constant 0 : i32
    %c0_i32_1 = arith.constant 0 : i32
    return %arg0, %c0_i32, %c0_i32_0 : i32, i32, i32
  }
}

</mosaic_0001>

<bundles_post_ra>
// kernel: tpu_custom_call.1
= control target key start
LH: loop header
LB: loop body
LE: loop exit
PB: predicated region body
PF: predicated region fallthrough
CT: control target
= control target key end

     0   :  { %12 = vsyncpa [#allocation4], 0  ;;  %s787_s0 = inlined_call_operand.vmem [shape: f32[2,4,16], index: 0, kind: input, shape index: {}]   ;;  %s788_s1 = inlined_call_operand.vmem [shape: f32[8,8], index: 1, kind: input, shape index: {}]   ;;  %s789_s2 = inlined_call_operand.vmem [shape: f32[8,1], index: 2, kind: input, shape index: {}]   ;;  %s790_s3 = inlined_call_operand.vmem [shape: f32[8,16], index: 3, kind: input, shape index: {}]   ;;  %s791_s4 = inlined_call_operand.vmem [shape: f32[8,1], index: 4, kind: input, shape index: {}]   ;;  %s792_s5 = inlined_call_operand.vmem [shape: f32[8,4], index: 5, kind: input, shape index: {}]   ;;  %s793_s6 = inlined_call_operand.vmem [shape: f32[8,1], index: 6, kind: input, shape index: {}]   ;;  %s794_s7 = inlined_call_operand.hbm [shape: f32[2,8,16], index: 7, kind: output, shape index: {}]  }
   0x1   :  { %14 = vsyncpa [#allocation4 + $0x1], 0  ;;  %s676_s24 = smov 0   ;;  %s678_s25 = smov 0  }
   0x2   :  { %s680_s26 = smov 0   ;;  %s682_s27 = smov 0  }
   0x3 LB: > { %s697_s28 = sadd.s32 4294967295, %s628_s27   ;;  %s501_s29 = sadd.s32 4294967294, %s628_s27   ;;  %s628_s27 = sphi %s682_s27, %s800_s27   ;;  %s624_s26 = sphi %s680_s26, %s799_s26   ;;  %s620_s25 = sphi %s678_s25, %s798_s25   ;;  %s616_s24 = sphi %s676_s24, %s797_s24  }
   0x4   : > { %s701_s30 = sadd.s32 1, %s628_s27   ;;  %s179_s8 = sadd.s32 1, %s624_s26 }
   0x5   : > { %s176_s9 = ssub.s32 %s628_s27, %s701_s30  ;;  %p189_p0 = scmp.ne.s32.totalorder %s624_s26, %s620_s25 }
   0x6   : > { %p177_p1 = scmp.eq.s32.totalorder %s176_s9, 0  ;;  %p190_p2 = scmp.eq.s32.totalorder %s697_s28, 1 }
   0x7   : > { %p195_p3 = scmp.ne.s32.totalorder %s620_s25, %s616_s24  ;;  %p196_p4 = scmp.eq.s32.totalorder %s501_s29, 1 }
   0x8   : > { %s712_s10 = scalar_select %p177_p1, %s624_s26, %s179_s8  }
   0x9   : > { %p714_p5 = por %p190_p2, %p189_p0  ;;  %p718_p6 = por %p196_p4, %p195_p3 }
   0xa   : > { %p504_p7 = scmp.ge.s32.totalorder %s628_s27, 1  ;;  %p239_p8 = scmp.lt.s32.totalorder %s628_s27, 3 }
   0xc   : > { %p240_p9 = pnand %p504_p7, %p239_p8 }
   0xd   : > { %p270_p10 = scmp.lt.s32.totalorder (!%p240_p9), %s697_s28, 1  ;;  %s631_s18 = smov (!%p240_p9), 2  }
   0xe   : > { %243 = sbr.rel (%p240_p9) target bundleno = 637 (0x27d), region = 48  ;;  %s632_s21 = smov (!%p240_p9), 124  }
   0xf   : > { %s633_s22 = smov (!%p240_p9), 127   ;;  %s267_s20 = sand.u32 (!%p240_p9), 1, %s620_s25  }
  0x10   : > { %s427_s15 = scalar_lea.sflag (!%p240_p9), [#allocation4], %s267_s20  ;;  %s586_s19 = scalar_lea.hbm (!%p240_p9), %s794_s7, 16 }
  0x13   : > { %vm274_vm0 = vcmask 142336   ;;  %v630_v0 = vmov 0.0   ;;  %s271_s13 = scalar_select %p270_p10, %s697_s28, 1  ;;  %v284_v2 = vld [vmem:[%s788_s1] sm:$0xff]  ;;  %vm281_vm1 = vcmask 142352   ;;  %vm295_vm2 = vcmask 1043456  }
  0x14   : > { %275 = vst.msk [vmem:[#allocation2] sm:$0xf] %vm274_vm0, %v630_v0  ;;  %287 = vrot.lane.b32.xlu1 %v284_v2, %s632_s21  ;;  %vm292_vm3 = vcmask 31744   ;;  %v342_v5 = vld [vmem:[%s789_s2] sm:$0xff]  ;;  %v634_v6 = vmov 0   ;;  %v350_v10 = vlaneseq  ;;  %vm364_vm5 = vcmask 130048  }
  0x15   : > { %s506_s14 = sshll.u32 %s271_s13, 2  ;;  %564 = vset.pattern.permute.xlu1 %v634_v6  ;;  %565 = vset.pattern.permute.xlu0 %v634_v6  ;;  %v390_v7 = vld [vmem:[%s793_s6] sm:$0xff]  ;;  %s635_s13 = smov 126  }
  0x16   : > { %s273_s17 = scalar_lea.vmem %s787_s0, %s506_s14  ;;  %v351_v13 = vand.u32 127, %v350_v10  ;;  %v358_v19 = vld [vmem:[%s791_s4] sm:$0xff]  ;;  %s505_s21 = sshll.u32 %s267_s20, 3 }
  0x17   : > { %v276_v1 = vld [vmem:[%s273_s17] sm:$0xf]  ;;  %s269_s9 = scalar_lea.vmem [#allocation3], %s505_s21 }
  0x18   : > { %278 = vrot.lane.b32.xlu0 %v276_v1, %s631_s18  ;;  %vm352_vm4 = vcmp.ge.s32.totalorder %v351_v13, 1  ;;  %v285_v21 = vld [vmem:[%s790_s3] sm:$0xff] }
  0x19   : > { %v389_v22 = vld [vmem:[%s792_s5] sm:$0xff] }
  0x1c   : > { %345 = vperm.xlu1 %564, %v342_v5  }
  0x24   : > { %393 = vperm.xlu1 %564, %v390_v7  }
  0x86   : > { %v288_v8 = vpop.permute.xlu1 %287 }
  0x8a   : > { %v279_v3 = vpop.permute.xlu0 %278 }
  0x8b   : > { %282 = vst.msk [vmem:[#allocation2] sm:$0xf] %vm281_vm1, %v279_v3 }
  0x8e   : > { %v346_v15 = vpop.permute.xlu1 %345 }
  0x92   : > { %v283_v4 = vld [vmem:[#allocation2] sm:$0xf] }
  0x93   : > { %290 = vrot.lane.b32.xlu0 %v283_v4, %s633_s22  ;;  %509 = vmatpush.msk.msra.mxu1 %vm295_vm2, %v283_v4 }
  0x94   : > { %510 = vmatmul.msk.f32.vlgmr.msra.gmra.mxu1 %vm292_vm3, %v284_v2 }
  0x96   : > { %v394_v28 = vpop.permute.xlu1 %393 }
  0x9b   : > { %361 = vperm.xlu0 %565, %v358_v19  }
 0x105   : > { %v291_v9 = vpop.permute.xlu0 %290 }
 0x106   : > { %507 = vmatpush.msk.msra.mxu0 %vm295_vm2, %v291_v9 }
 0x107   : > { %508 = vmatmul.msk.f32.vlgmr.msra.gmra.mxu0 %vm292_vm3, %v288_v8 }
 0x10d   : > { %v362_v24 = vpop.permute.xlu0 %361 }
 0x111   : > { %v339_v11 = vpop.f32.mrf.mxu1 }
 0x184   : > { %v315_v12 = vpop.f32.mrf.mxu0 }
 0x185   : > { %v340_v14 = vadd.f32 %v339_v11, %v315_v12 }
 0x187   : > { %v348_v16 = vadd.f32 %v346_v15, %v340_v14 }
 0x189   : > { %v349_v17 = vmax.f32 %v348_v16, 0.0 }
 0x18b   : > { %v353_v18 = vsel %vm352_vm4, %v349_v17, 0.0 }
 0x18c   : > { %355 = vrot.lane.b32.xlu2 %v353_v18, %s633_s22  ;;  %s516_s22 = sshll.u32 %s697_s28, 3 }
 0x18d   : > { %s437_s8 = scalar_lea.hbm %s794_s7, %s516_s22 }
 0x18e   : > { %s441_s14 = sshll.u32 %s437_s8, 4  ;;  %s442_s14 = int_to_ptr.hbm [resolvable:$true] %s441_s14 }
 0x18f   : > { %s580_s28 = sshra.s32 %s442_s14, 4  ;;  %s581_s28 = int_to_ptr.hbm [resolvable:$true] %s580_s28 }
 0x190   : > { %s582_s16 = scalar_lea.hbm %s581_s28, 8  ;;  %p587_p0 = scmp.lt.s32.totalorder %s581_s28, %s794_s7 }
 0x191   : > { %p583_p11 = scmp.ne.s32.totalorder %s581_s28, %s582_s16  ;;  %p588_p1 = scmp.lt.s32.totalorder %s586_s19, %s582_s16 }
 0x193   : > { %p584_p12 = pnand %p583_p11, %p714_p5  ;;  %p589_p2 = por %p588_p1, %p587_p0 }
 0x194   : > { %396 = vrot.lane.b32.xlu2 %v283_v4, %s635_s13  ;;  %s439_s13 = sshll.u32 %s269_s9, 4  ;;  %s440_s13 = int_to_ptr.vmem [resolvable:$true] %s439_s13 }
 0x195   : > { %p585_p13 = pneg %p584_p12 }
 0x197   : > { %p590_p3 = pnand %p589_p2, %p585_p13 }
 0x1e6   : > { %v356_v20 = vpop.permute.xlu2 %355 }
 0x1e7   : > { %382 = vmatpush.msra.mxu2 %v356_v20 }
 0x1e9   : > { %511 = vmatpush.msk.msra.mxu2 %vm352_vm4, %v349_v17 }
 0x1ea   : > { %512 = vmatmul.msk.f32.vlgmr.msra.gmra.mxu2 %vm364_vm5, %v285_v21 }
 0x1ee   : > { %v397_v23 = vpop.permute.xlu2 %396 }
 0x1ef   : > { %513 = vmatpush.msk.msra.mxu3 %vm295_vm2, %v397_v23 }
 0x1f0   : > { %514 = vmatmul.msk.f32.vlgmr.msra.gmra.mxu3 %vm292_vm3, %v389_v22 }
 0x26d   : > { %v385_v25 = vpop.f32.mrf.mxu2 }
 0x26e   : > { %v386_v26 = vadd.f32 %v385_v25, %v362_v24 }
 0x270   : > { %v388_v27 = vmax.f32 %v386_v26, 0.0 }
 0x273   : > { %v420_v29 = vpop.f32.mrf.mxu3 }
 0x274   : > { %v421_v30 = vadd.f32 %v420_v29, %v394_v28 }
 0x276   : > { %v423_v31 = vadd.f32 %v421_v30, %v388_v27 }
 0x278   : > { %v424_v32 = vmax.f32 %v423_v31, 0.0 }
 0x27a   : > { %425 = vst.msk [vmem:[%s269_s9] sm:$0xff] %vm364_vm5, %v424_v32 }
 0x27b   : > { %593 = shalt.err (!%p590_p3)
}
 0x27c   : > { %519 = dma.vmem_to_hbm [thread:$0]  (%p714_p5), %s440_s13, 128, %s442_s14, %s427_s15  }
 0x27d PF: > { %p525_p4 = scmp.ge.s32.totalorder %s628_s27, 2  ;;  %s453_s20 = sand.u32 1, %s616_s24  }
 0x27e   : > { %s454_s23 = scalar_lea.sflag [#allocation4], %s453_s20 }
 0x27f   : > { %p522_p7 = pnand %p525_p4, %p718_p6 }
 0x281   : > { %p523_p8 = pneg %p522_p7 }
 0x283   : > { %611 = dma.done.wait (%p523_p8), %s454_s23, 128  }
 0x284   : > { %613 = vsyncadd (%p523_p8), %s454_s23, 4294967168  ;;  %p17_p9 = scmp.ge.s32.totalorder %s701_s30, 4   ;;  %s797_s24 = smov %s620_s25 }
 0x285   : > { %s798_s25 = smov %s624_s26  ;;  %s799_s26 = smov %s712_s10 }
 0x286   : > { %s800_s27 = smov %s701_s30  ;;  %19 = sbr.rel (!%p17_p9) target bundleno = 3 (0x3), region = 83 }
 0x28b   :  { %460 = vsyncpa [#allocation4], 1 }
 0x28c   :  { %462 = vsyncpa [#allocation4 + $0x1], 1 }

</bundles_post_ra>
